<compile_context>
chip_gen: v7x
topology: tpu7x:2x2x1
jax: 0.10.0
libtpu: 0.0.40
codegen_flags: <defaults>
</compile_context>

<pallas_src>
import functools

import numpy as np
import jax
import jax.numpy as jnp
from jax import lax
from jax.experimental import pallas as pl
from jax.experimental.pallas import tpu as pltpu


# -----------------------------------------------------------------------------
# Kernel
# -----------------------------------------------------------------------------
def minlstm_kernel(x_ref, w_in_ref, w_out_ref, o_ref,
                   a_ref, b_ref, hs_ref, silu_ref, carry_ref, *,
                   bb, tc, hidden, unroll, compute_dtype):
    """One (batch-block, time-chunk) tile per grid step.

    x_ref     : (1, Tc*bb, E)  time-major rows within the chunk: row = s*bb + b
    w_in_ref  : (E, 4H)        fused gate weights, column blocks [out1 | h | f | i]
    w_out_ref : (H, E)
    o_ref     : (1, Tc*bb, E)
    a_ref, b_ref      : (Tc*bb, H) f32 scratch (recurrence coefficients)
    hs_ref, silu_ref  : (Tc*bb, H) compute-dtype scratch (hidden states, SiLU gate)
    carry_ref         : (bb, H) f32 scratch; persists across time chunks
    """
    H = hidden
    t = pl.program_id(1)

    @pl.when(t == 0)
    def _():
        carry_ref[...] = jnp.zeros_like(carry_ref)

    # ---- fused gate projection: one (Tc*bb, E) x (E, 4H) MXU matmul ---------
    xm = x_ref[0].astype(compute_dtype)
    y = jnp.dot(xm, w_in_ref[...], preferred_element_type=jnp.float32)

    out1 = y[:, 0 * H:1 * H]
    hcan = y[:, 1 * H:2 * H]
    f = jax.nn.sigmoid(y[:, 2 * H:3 * H])
    i = jax.nn.sigmoid(y[:, 3 * H:4 * H])

    # SiLU gate to explicit scratch -> no slab-sized value live across the scan.
    silu_ref[...] = (out1 * jax.nn.sigmoid(out1)).astype(silu_ref.dtype)

    # Gate normalization: EUP reciprocal + one Newton step (near-exact, cheap).
    z = f + i + 0.0001
    r = pl.reciprocal(z, approx=True)
    r = r * (2.0 - z * r)
    a_ref[...] = f * r                     # (Tc*bb, H) f32
    b_ref[...] = hcan * (i * r)            # (Tc*bb, H) f32

    # ---- linear recurrence over the time chunk ------------------------------
    #   h_s = a_s * h_{s-1} + b_s, carry (bb, H): batch on sublanes, H on lanes.
    def step(s, carry):
        row = pl.multiple_of(s * bb, bb)
        a_t = a_ref[pl.ds(row, bb), :]
        b_t = b_ref[pl.ds(row, bb), :]
        carry = a_t * carry + b_t
        hs_ref[pl.ds(row, bb), :] = carry.astype(hs_ref.dtype)
        return carry

    carry_ref[...] = lax.fori_loop(0, tc, step, carry_ref[...], unroll=unroll)

    # ---- output gating + projection (one MXU matmul on the chunk) -----------
    gated = (silu_ref[...] * hs_ref[...]).astype(compute_dtype)
    o_ref[0] = jnp.dot(gated, w_out_ref[...],
                       preferred_element_type=jnp.float32).astype(o_ref.dtype)


# -----------------------------------------------------------------------------
# Wrapper: tiling heuristics + pallas_call
# -----------------------------------------------------------------------------
def _choose_batch_block(B):
    """Prefer bb that is a multiple of 8 (full sublane tiles in the scan) while
    keeping several grid-parallel batch blocks when B allows (v7x megacore)."""
    divisors = [d for d in range(B, 0, -1) if B % d == 0]
    for want_nb in (4, 2, 1):
        for d in divisors:
            if d % 8 == 0 and B // d >= want_nb:
                return d
    return B


def _vmem_estimate(bb, tc, E, H, x_isz, o_isz, w_isz, s_isz):
    """Rough peak-VMEM model for one grid step (double-buffered I/O + weights,
    scratch slabs, projection result + a couple of f32 elementwise temps)."""
    blk = tc * bb
    xbuf = 2 * blk * E * x_isz
    obuf = 2 * blk * E * o_isz
    wbuf = 2 * (E * 4 * H + H * E) * w_isz
    scratch = blk * H * (2 * 4 + 2 * s_isz) + bb * H * 4
    temps = blk * 4 * H * 4 + 2 * blk * H * 4
    return xbuf + obuf + wbuf + scratch + temps


def minlstm_forward(x, w_in_fused, w_out_t, *,
                    batch_block=None, time_chunk=None, unroll=8,
                    compute_dtype=jnp.bfloat16, out_dtype=None,
                    vmem_budget_bytes=48 * 1024 * 1024):
    """minLSTM forward.

    x          : (B, S, E)
    w_in_fused : (E, 4H)  column blocks [out1 | h | f | i] (head-flattened f/i)
    w_out_t    : (H, E)
    compute_dtype: MXU-input dtype (bf16 recommended on all generations);
                   accumulation and the recurrence stay f32.
    """
    B, S, E = x.shape
    H = w_in_fused.shape[-1] // 4
    cdt = x.dtype if compute_dtype is None else jnp.dtype(compute_dtype)
    out_dtype = x.dtype if out_dtype is None else jnp.dtype(out_dtype)
    scratch_dtype = cdt

    bb = _choose_batch_block(B) if batch_block is None else batch_block
    assert B % bb == 0, (B, bb)
    nb = B // bb

    isz = lambda dt: jnp.dtype(dt).itemsize
    if time_chunk is None:
        tc = 1
        for d in range(S, 0, -1):
            if S % d == 0 and _vmem_estimate(
                    bb, d, E, H, isz(x.dtype), isz(out_dtype),
                    isz(cdt), isz(scratch_dtype)) <= vmem_budget_bytes:
                tc = d
                break
    else:
        tc = time_chunk
    assert S % tc == 0, (S, tc)
    nt = S // tc

    est = _vmem_estimate(bb, tc, E, H, isz(x.dtype), isz(out_dtype),
                         isz(cdt), isz(scratch_dtype))
    vmem_limit = int(min(max(vmem_budget_bytes, est), 100 * 1024 * 1024))

    # Weights shipped to the kernel in the MXU compute dtype (bf16 by default).
    w_in_c = w_in_fused.astype(cdt)
    w_out_c = w_out_t.astype(cdt)

    # Time-major within each batch block: (nb, S*bb, E), row = s*bb + b_local.
    # TODO(synk): fold this relayout (and the inverse below) into the producer.
    xr = x.reshape(nb, bb, S, E).transpose(0, 2, 1, 3).reshape(nb, S * bb, E)

    kern = functools.partial(minlstm_kernel, bb=bb, tc=tc, hidden=H,
                             unroll=min(unroll, tc), compute_dtype=cdt)

    cost = pl.CostEstimate(
        flops=10 * B * S * E * H,                     # 2*B*S*E*4H + 2*B*S*H*E
        transcendentals=4 * B * S * H,                # 3 sigmoids + reciprocal
        bytes_accessed=(B * S * E * (isz(x.dtype) + isz(out_dtype))
                        + (E * 4 * H + H * E) * isz(cdt)))

    out = pl.pallas_call(
        kern,
        out_shape=jax.ShapeDtypeStruct((nb, S * bb, E), out_dtype),
        grid_spec=pltpu.PrefetchScalarGridSpec(
            num_scalar_prefetch=0,
            grid=(nb, nt),
            in_specs=[
                pl.BlockSpec((1, tc * bb, E), lambda j, t: (j, t, 0)),
                # Weights: constant index_map -> resident across grid steps.
                pl.BlockSpec((E, 4 * H), lambda j, t: (0, 0)),
                pl.BlockSpec((H, E), lambda j, t: (0, 0)),
            ],
            out_specs=pl.BlockSpec((1, tc * bb, E), lambda j, t: (j, t, 0)),
            scratch_shapes=[
                pltpu.VMEM((tc * bb, H), jnp.float32),      # a
                pltpu.VMEM((tc * bb, H), jnp.float32),      # b
                pltpu.VMEM((tc * bb, H), scratch_dtype),    # hidden states
                pltpu.VMEM((tc * bb, H), scratch_dtype),    # silu(out1)
                pltpu.VMEM((bb, H), jnp.float32),           # recurrence carry
            ]),
        compiler_params=pltpu.CompilerParams(
            dimension_semantics=("parallel", "arbitrary"),
            vmem_limit_bytes=vmem_limit),
        cost_estimate=cost,
    )(xr, w_in_c, w_out_c)

    return out.reshape(nb, S, bb, E).transpose(0, 2, 1, 3).reshape(B, S, E)


# -----------------------------------------------------------------------------
# Parameter construction / reference
# -----------------------------------------------------------------------------
def make_params(key, emb_dim, hidden_dim, nb_heads):
    """Deterministic init matching the module's parameter shapes."""
    k1, k2 = jax.random.split(key)
    in_std = emb_dim ** (-0.5)
    out_std = hidden_dim ** (-0.5)
    # nn.Linear weight shapes: W_in (4H, E), W_out (E, H)
    w_in = (jax.random.truncated_normal(k1, -3.0, 3.0, (4 * hidden_dim, emb_dim))
            * in_std).astype(jnp.float32)
    w_out = (jax.random.truncated_normal(k2, -3.0, 3.0, (emb_dim, hidden_dim))
             * out_std).astype(jnp.float32)
    return w_in, w_out


def fuse_w_in(w_in, hidden_dim, nb_heads):
    """W_in (4H, E) -> fused (E, 4H) with column blocks [out1 | h | f | i];
    f/i columns in head-flattened channel order (reproduces the PyTorch
    transpose + reshape(B*nh, 2*hd, S) + chunk)."""
    H = hidden_dim
    hd = H // nb_heads
    w_out1 = w_in[0:H]                                   # (H, E)
    w_h = w_in[H:2 * H]                                  # (H, E)
    fi = w_in[2 * H:].reshape(nb_heads, 2 * hd, -1)      # (nh, 2hd, E)
    w_f = fi[:, :hd].reshape(H, -1)                      # (H, E)
    w_i = fi[:, hd:].reshape(H, -1)                      # (H, E)
    return jnp.concatenate([w_out1, w_h, w_f, w_i], axis=0).T   # (E, 4H)


def reference_forward(x, w_in, w_out, hidden_dim, nb_heads):
    """Pure-JAX reference mirroring the PyTorch forward (conv_size=None)."""
    B, S, E = x.shape
    H = hidden_dim
    hd = H // nb_heads
    y = jnp.einsum('bse,oe->bso', x, w_in)               # (B, S, 4H)
    tmp, fi = y[..., :2 * H], y[..., 2 * H:]
    out1, h = tmp[..., :H], tmp[..., H:]
    fi = jnp.swapaxes(fi, 1, 2)                          # (B, 2H, S)
    h = jnp.swapaxes(h, 1, 2)                            # (B, H, S)
    fi = fi.reshape(B * nb_heads, 2 * hd, S)
    h = h.reshape(B * nb_heads, hd, S)
    f, i = jax.nn.sigmoid(fi[:, :hd]), jax.nn.sigmoid(fi[:, hd:])
    denom = 1.0 / (f + i + 0.0001)
    a, b = f * denom, h * i * denom

    def step(carry, ab):
        a_t, b_t = ab
        new = a_t * carry + b_t
        return new, new

    _, hs = lax.scan(step, jnp.zeros((B * nb_heads, hd)),
                     (jnp.moveaxis(a, -1, 0), jnp.moveaxis(b, -1, 0)))
    hs = jnp.moveaxis(hs, 0, -1)                         # (B*nh, hd, S)
    out2 = jnp.swapaxes(hs.reshape(B, H, S), 1, 2)       # (B, S, H)
    out = jax.nn.silu(out1) * out2
    return jnp.einsum('bsh,eh->bse', out, w_out)


# -----------------------------------------------------------------------------
# Demo / self-test
# -----------------------------------------------------------------------------
if __name__ == "__main__":
    bsz, seq_len = 16, 16
    emb_dim, hidden_dim, nb_heads = 16, 32, 4

    key = jax.random.PRNGKey(0)
    kx, kp = jax.random.split(key)
    x = jax.random.normal(kx, (bsz, seq_len, emb_dim), dtype=jnp.float32)
    w_in, w_out = make_params(kp, emb_dim, hidden_dim, nb_heads)

    w_in_fused = fuse_w_in(w_in, hidden_dim, nb_heads)    # (E, 4H)
    w_out_t = jnp.asarray(w_out).T                        # (H, E)

    ref = jax.block_until_ready(
        reference_forward(x, w_in, w_out, hidden_dim, nb_heads))

    # f32 MXU path (exactness check); time_chunk=4 exercises the chunked
    # recurrence with the carry persisting across grid steps (bb auto -> 8,
    # so grid = (2 parallel batch blocks, 4 time chunks)).
    out_f32 = jax.block_until_ready(
        minlstm_forward(x, w_in_fused, w_out_t,
                        time_chunk=4, compute_dtype=jnp.float32))
    assert out_f32.shape == (bsz, seq_len, emb_dim)
    np.testing.assert_allclose(np.asarray(out_f32), np.asarray(ref),
                               rtol=2e-2, atol=2e-2)

    # Default bf16-MXU path (recommended on all generations).
    out_bf16 = jax.block_until_ready(
        minlstm_forward(x, w_in_fused, w_out_t, time_chunk=4))
    assert out_bf16.shape == (bsz, seq_len, emb_dim)
    np.testing.assert_allclose(np.asarray(out_bf16), np.asarray(ref),
                               rtol=5e-2, atol=5e-2)

    print("KERNEL_OK")
</pallas_src>

<mosaic_0001>
module attributes {stable_mosaic.version = 11 : i64} {
  func.func @minlstm_kernel(%arg0: i32, %arg1: i32, %arg2: memref<1x32x16xf32, #tpu.memory_space<vmem>>, %arg3: memref<16x128xf32, #tpu.memory_space<vmem>>, %arg4: memref<32x16xf32, #tpu.memory_space<vmem>>, %arg5: memref<1x32x16xf32, #tpu.memory_space<vmem>>, %arg6: memref<32x32xf32, #tpu.memory_space<vmem>>, %arg7: memref<32x32xf32, #tpu.memory_space<vmem>>, %arg8: memref<32x32xf32, #tpu.memory_space<vmem>>, %arg9: memref<32x32xf32, #tpu.memory_space<vmem>>, %arg10: memref<8x32xf32, #tpu.memory_space<vmem>>) attributes {dimension_semantics = [#tpu.dimension_semantics<parallel>, #tpu.dimension_semantics<arbitrary>], iteration_bounds = array<i64: 2, 4>, scalar_prefetch = 0 : i64, scratch_operands = 5 : i64, tpu.core_type = #tpu.core_type<tc>, window_params = [{transform_indices = @transform_0, window_bounds = array<i64: 1, 32, 16>}, {pipeline_mode = #tpu.pipeline_mode<synchronous>, transform_indices = @transform_1, window_bounds = array<i64: 16, 128>}, {pipeline_mode = #tpu.pipeline_mode<synchronous>, transform_indices = @transform_2, window_bounds = array<i64: 32, 16>}, {transform_indices = @transform_3, window_bounds = array<i64: 1, 32, 16>}]} {
    %c0_i32 = arith.constant 0 : i32
    %0 = arith.cmpi eq, %arg1, %c0_i32 : i32
    %1 = arith.extui %0 : i1 to i32
    %c0_i32_0 = arith.constant 0 : i32
    %2 = arith.cmpi ne, %1, %c0_i32_0 : i32
    scf.if %2 {
      %cst_46 = arith.constant 0.000000e+00 : f32
      %91 = vector.broadcast %cst_46 : f32 to vector<8x32xf32>
      %c0_47 = arith.constant 0 : index
      %c0_48 = arith.constant 0 : index
      %92 = vector.load %arg10[%c0_47, %c0_48] : memref<8x32xf32, #tpu.memory_space<vmem>>, vector<8x32xf32>
      tpu.vector_store %arg10[%c0_47, %c0_48], %91 {strides = array<i32>} : memref<8x32xf32, #tpu.memory_space<vmem>>, vector<8x32xf32>,
    } else {
    }
    %c0 = arith.constant 0 : index
    %c0_1 = arith.constant 0 : index
    %c0_2 = arith.constant 0 : index
    %3 = vector.load %arg2[%c0, %c0_1, %c0_2] : memref<1x32x16xf32, #tpu.memory_space<vmem>>, vector<1x32x16xf32>
    %4 = vector.shape_cast %3 : vector<1x32x16xf32> to vector<32x16xf32>
    %c0_3 = arith.constant 0 : index
    %c0_4 = arith.constant 0 : index
    %5 = vector.load %arg3[%c0_3, %c0_4] : memref<16x128xf32, #tpu.memory_space<vmem>>, vector<16x128xf32>
    %cst = arith.constant dense<0.000000e+00> : vector<32x128xf32>
    %6 = tpu.matmul %4, %5, %cst {dimension_numbers = #tpu.dot_dimension_numbers<[1], [0], [0], [1], [0, 0, 1, 1], [], []>} : vector<32x16xf32>, vector<16x128xf32>, vector<32x128xf32> -> vector<32x128xf32>
    %7 = vector.extract_strided_slice %6 {offsets = [0, 0], sizes = [32, 32], strides = [1, 1]} : vector<32x128xf32> to vector<32x32xf32>
    %8 = vector.extract_strided_slice %6 {offsets = [0, 32], sizes = [32, 32], strides = [1, 1]} : vector<32x128xf32> to vector<32x32xf32>
    %9 = vector.extract_strided_slice %6 {offsets = [0, 64], sizes = [32, 32], strides = [1, 1]} : vector<32x128xf32> to vector<32x32xf32>
    %10 = arith.negf %9 : vector<32x32xf32>
    %11 = math.exp %10 : vector<32x32xf32>
    %cst_5 = arith.constant 1.000000e+00 : f32
    %12 = vector.broadcast %cst_5 : f32 to vector<32x32xf32>
    %13 = arith.addf %12, %11 : vector<32x32xf32>
    %14 = arith.divf %12, %13 : vector<32x32xf32>
    %15 = vector.extract_strided_slice %6 {offsets = [0, 96], sizes = [32, 32], strides = [1, 1]} : vector<32x128xf32> to vector<32x32xf32>
    %16 = arith.negf %15 : vector<32x32xf32>
    %17 = math.exp %16 : vector<32x32xf32>
    %cst_6 = arith.constant 1.000000e+00 : f32
    %18 = vector.broadcast %cst_6 : f32 to vector<32x32xf32>
    %19 = arith.addf %18, %17 : vector<32x32xf32>
    %20 = arith.divf %18, %19 : vector<32x32xf32>
    %21 = arith.negf %7 : vector<32x32xf32>
    %22 = math.exp %21 : vector<32x32xf32>
    %cst_7 = arith.constant 1.000000e+00 : f32
    %23 = vector.broadcast %cst_7 : f32 to vector<32x32xf32>
    %24 = arith.addf %23, %22 : vector<32x32xf32>
    %25 = arith.divf %23, %24 : vector<32x32xf32>
    %26 = arith.mulf %7, %25 : vector<32x32xf32>
    %c0_8 = arith.constant 0 : index
    %c0_9 = arith.constant 0 : index
    %27 = vector.load %arg9[%c0_8, %c0_9] : memref<32x32xf32, #tpu.memory_space<vmem>>, vector<32x32xf32>
    tpu.vector_store %arg9[%c0_8, %c0_9], %26 {strides = array<i32>} : memref<32x32xf32, #tpu.memory_space<vmem>>, vector<32x32xf32>,
    %28 = arith.addf %14, %20 : vector<32x32xf32>
    %cst_10 = arith.constant 9.99999974E-5 : f32
    %29 = vector.broadcast %cst_10 : f32 to vector<32x32xf32>
    %30 = arith.addf %28, %29 : vector<32x32xf32>
    %31 = tpu.reciprocal %30 {approx = true} : vector<32x32xf32> -> vector<32x32xf32>
    %32 = arith.mulf %30, %31 : vector<32x32xf32>
    %cst_11 = arith.constant 2.000000e+00 : f32
    %33 = vector.broadcast %cst_11 : f32 to vector<32x32xf32>
    %34 = arith.subf %33, %32 : vector<32x32xf32>
    %35 = arith.mulf %31, %34 : vector<32x32xf32>
    %36 = arith.mulf %14, %35 : vector<32x32xf32>
    %c0_12 = arith.constant 0 : index
    %c0_13 = arith.constant 0 : index
    %37 = vector.load %arg6[%c0_12, %c0_13] : memref<32x32xf32, #tpu.memory_space<vmem>>, vector<32x32xf32>
    tpu.vector_store %arg6[%c0_12, %c0_13], %36 {strides = array<i32>} : memref<32x32xf32, #tpu.memory_space<vmem>>, vector<32x32xf32>,
    %38 = arith.mulf %20, %35 : vector<32x32xf32>
    %39 = arith.mulf %8, %38 : vector<32x32xf32>
    %c0_14 = arith.constant 0 : index
    %c0_15 = arith.constant 0 : index
    %40 = vector.load %arg7[%c0_14, %c0_15] : memref<32x32xf32, #tpu.memory_space<vmem>>, vector<32x32xf32>
    tpu.vector_store %arg7[%c0_14, %c0_15], %39 {strides = array<i32>} : memref<32x32xf32, #tpu.memory_space<vmem>>, vector<32x32xf32>,
    %c0_16 = arith.constant 0 : index
    %c0_17 = arith.constant 0 : index
    %41 = vector.load %arg10[%c0_16, %c0_17] : memref<8x32xf32, #tpu.memory_space<vmem>>, vector<8x32xf32>
    %c0_i32_18 = arith.constant 0 : i32
    %c8_i32 = arith.constant 8 : i32
    %42 = arith.muli %c0_i32_18, %c8_i32 : i32
    %43 = tpu.assume_multiple %42, 8 : i32
    %44 = arith.index_cast %43 : i32 to index
    %c0_19 = arith.constant 0 : index
    %45 = vector.load %arg6[%44, %c0_19] : memref<32x32xf32, #tpu.memory_space<vmem>>, vector<8x32xf32>
    %46 = arith.index_cast %43 : i32 to index
    %c0_20 = arith.constant 0 : index
    %47 = vector.load %arg7[%46, %c0_20] : memref<32x32xf32, #tpu.memory_space<vmem>>, vector<8x32xf32>
    %48 = arith.mulf %45, %41 : vector<8x32xf32>
    %49 = arith.addf %48, %47 : vector<8x32xf32>
    %50 = arith.index_cast %43 : i32 to index
    %c0_21 = arith.constant 0 : index
    %51 = vector.load %arg8[%50, %c0_21] : memref<32x32xf32, #tpu.memory_space<vmem>>, vector<8x32xf32>
    tpu.vector_store %arg8[%50, %c0_21], %49 {strides = array<i32>} : memref<32x32xf32, #tpu.memory_space<vmem>>, vector<8x32xf32>,
    %c1_i32 = arith.constant 1 : i32
    %c8_i32_22 = arith.constant 8 : i32
    %52 = arith.muli %c1_i32, %c8_i32_22 : i32
    %53 = tpu.assume_multiple %52, 8 : i32
    %54 = arith.index_cast %53 : i32 to index
    %c0_23 = arith.constant 0 : index
    %55 = vector.load %arg6[%54, %c0_23] : memref<32x32xf32, #tpu.memory_space<vmem>>, vector<8x32xf32>
    %56 = arith.index_cast %53 : i32 to index
    %c0_24 = arith.constant 0 : index
    %57 = vector.load %arg7[%56, %c0_24] : memref<32x32xf32, #tpu.memory_space<vmem>>, vector<8x32xf32>
    %58 = arith.mulf %55, %49 : vector<8x32xf32>
    %59 = arith.addf %58, %57 : vector<8x32xf32>
    %60 = arith.index_cast %53 : i32 to index
    %c0_25 = arith.constant 0 : index
    %61 = vector.load %arg8[%60, %c0_25] : memref<32x32xf32, #tpu.memory_space<vmem>>, vector<8x32xf32>
    tpu.vector_store %arg8[%60, %c0_25], %59 {strides = array<i32>} : memref<32x32xf32, #tpu.memory_space<vmem>>, vector<8x32xf32>,
    %c2_i32 = arith.constant 2 : i32
    %c8_i32_26 = arith.constant 8 : i32
    %62 = arith.muli %c2_i32, %c8_i32_26 : i32
    %63 = tpu.assume_multiple %62, 8 : i32
    %64 = arith.index_cast %63 : i32 to index
    %c0_27 = arith.constant 0 : index
    %65 = vector.load %arg6[%64, %c0_27] : memref<32x32xf32, #tpu.memory_space<vmem>>, vector<8x32xf32>
    %66 = arith.index_cast %63 : i32 to index
    %c0_28 = arith.constant 0 : index
    %67 = vector.load %arg7[%66, %c0_28] : memref<32x32xf32, #tpu.memory_space<vmem>>, vector<8x32xf32>
    %68 = arith.mulf %65, %59 : vector<8x32xf32>
    %69 = arith.addf %68, %67 : vector<8x32xf32>
    %70 = arith.index_cast %63 : i32 to index
    %c0_29 = arith.constant 0 : index
    %71 = vector.load %arg8[%70, %c0_29] : memref<32x32xf32, #tpu.memory_space<vmem>>, vector<8x32xf32>
    tpu.vector_store %arg8[%70, %c0_29], %69 {strides = array<i32>} : memref<32x32xf32, #tpu.memory_space<vmem>>, vector<8x32xf32>,
    %c3_i32 = arith.constant 3 : i32
    %c8_i32_30 = arith.constant 8 : i32
    %72 = arith.muli %c3_i32, %c8_i32_30 : i32
    %73 = tpu.assume_multiple %72, 8 : i32
    %74 = arith.index_cast %73 : i32 to index
    %c0_31 = arith.constant 0 : index
    %75 = vector.load %arg6[%74, %c0_31] : memref<32x32xf32, #tpu.memory_space<vmem>>, vector<8x32xf32>
    %76 = arith.index_cast %73 : i32 to index
    %c0_32 = arith.constant 0 : index
    %77 = vector.load %arg7[%76, %c0_32] : memref<32x32xf32, #tpu.memory_space<vmem>>, vector<8x32xf32>
    %78 = arith.mulf %75, %69 : vector<8x32xf32>
    %79 = arith.addf %78, %77 : vector<8x32xf32>
    %80 = arith.index_cast %73 : i32 to index
    %c0_33 = arith.constant 0 : index
    %81 = vector.load %arg8[%80, %c0_33] : memref<32x32xf32, #tpu.memory_space<vmem>>, vector<8x32xf32>
    tpu.vector_store %arg8[%80, %c0_33], %79 {strides = array<i32>} : memref<32x32xf32, #tpu.memory_space<vmem>>, vector<8x32xf32>,
    %c4_i32 = arith.constant 4 : i32
    %c0_34 = arith.constant 0 : index
    %c0_35 = arith.constant 0 : index
    %82 = vector.load %arg10[%c0_34, %c0_35] : memref<8x32xf32, #tpu.memory_space<vmem>>, vector<8x32xf32>
    tpu.vector_store %arg10[%c0_34, %c0_35], %79 {strides = array<i32>} : memref<8x32xf32, #tpu.memory_space<vmem>>, vector<8x32xf32>,
    %c0_36 = arith.constant 0 : index
    %c0_37 = arith.constant 0 : index
    %83 = vector.load %arg9[%c0_36, %c0_37] : memref<32x32xf32, #tpu.memory_space<vmem>>, vector<32x32xf32>
    %c0_38 = arith.constant 0 : index
    %c0_39 = arith.constant 0 : index
    %84 = vector.load %arg8[%c0_38, %c0_39] : memref<32x32xf32, #tpu.memory_space<vmem>>, vector<32x32xf32>
    %85 = arith.mulf %83, %84 : vector<32x32xf32>
    %c0_40 = arith.constant 0 : index
    %c0_41 = arith.constant 0 : index
    %86 = vector.load %arg4[%c0_40, %c0_41] : memref<32x16xf32, #tpu.memory_space<vmem>>, vector<32x16xf32>
    %cst_42 = arith.constant dense<0.000000e+00> : vector<32x16xf32>
    %87 = tpu.matmul %85, %86, %cst_42 {dimension_numbers = #tpu.dot_dimension_numbers<[1], [0], [0], [1], [0, 0, 1, 1], [], []>} : vector<32x32xf32>, vector<32x16xf32>, vector<32x16xf32> -> vector<32x16xf32>
    %c0_43 = arith.constant 0 : index
    %c0_44 = arith.constant 0 : index
    %c0_45 = arith.constant 0 : index
    %88 = vector.load %arg5[%c0_43, %c0_44, %c0_45] : memref<1x32x16xf32, #tpu.memory_space<vmem>>, vector<1x32x16xf32>
    %89 = vector.shape_cast %88 : vector<1x32x16xf32> to vector<32x16xf32>
    %90 = vector.shape_cast %87 : vector<32x16xf32> to vector<1x32x16xf32>
    tpu.vector_store %arg5[%c0_43, %c0_44, %c0_45], %90 {strides = array<i32>} : memref<1x32x16xf32, #tpu.memory_space<vmem>>, vector<1x32x16xf32>,
    return
  }
  func.func @transform_0(%arg0: i32, %arg1: i32) -> (i32, i32, i32) {
    %c0_i32 = arith.constant 0 : i32
    %c0_i32_0 = arith.constant 0 : i32
    return %arg0, %arg1, %c0_i32 : i32, i32, i32
  }
  func.func @transform_1(%arg0: i32, %arg1: i32) -> (i32, i32) {
    %c0_i32 = arith.constant 0 : i32
    %c0_i32_0 = arith.constant 0 : i32
    %c0_i32_1 = arith.constant 0 : i32
    return %c0_i32, %c0_i32_0 : i32, i32
  }
  func.func @transform_2(%arg0: i32, %arg1: i32) -> (i32, i32) {
    %c0_i32 = arith.constant 0 : i32
    %c0_i32_0 = arith.constant 0 : i32
    %c0_i32_1 = arith.constant 0 : i32
    return %c0_i32, %c0_i32_0 : i32, i32
  }
  func.func @transform_3(%arg0: i32, %arg1: i32) -> (i32, i32, i32) {
    %c0_i32 = arith.constant 0 : i32
    %c0_i32_0 = arith.constant 0 : i32
    return %arg0, %arg1, %c0_i32 : i32, i32, i32
  }
}

</mosaic_0001>

<bundles_post_ra>
// kernel: tpu_custom_call.1
= control target key start
LH: loop header
LB: loop body
LE: loop exit
PB: predicated region body
PF: predicated region fallthrough
CT: control target
= control target key end

     0   :  { %s923_s12 = smov 0   ;;  %s925_s13 = smov 0   ;;  %s1076_s0 = inlined_call_operand.vmem [shape: f32[2,128,16], index: 0, kind: input, shape index: {}]   ;;  %s1077_s1 = inlined_call_operand.vmem [shape: f32[16,128], index: 1, kind: input, shape index: {}]   ;;  %s1078_s2 = inlined_call_operand.vmem [shape: f32[32,16], index: 2, kind: input, shape index: {}]   ;;  %s1079_s3 = inlined_call_operand.vmem [shape: f32[2,128,16], index: 3, kind: output, shape index: {}]  }
   0x1   :  { %s927_s14 = smov 0   ;;  %s929_s15 = smov 0  }
   0x2   :  { %s931_s16 = smov 0  }
   0x3 LB: > { %s22_s17 = sadd.s32 1, %s889_s14  ;;  %s25_s18 = sadd.s32 1, %s893_s15  ;;  %s897_s16 = sphi %s931_s16, %s13_s16   ;;  %s893_s15 = sphi %s929_s15, %s1083_s15   ;;  %s889_s14 = sphi %s927_s14, %s1082_s14   ;;  %s885_s13 = sphi %s925_s13, %s1081_s13   ;;  %s881_s12 = sphi %s923_s12, %s1080_s12  }
   0x4   : > { %p23_p0 = scmp.ge.s32.totalorder %s22_s17, 4  ;;  %p719_p1 = scmp.ge.s32.totalorder %s897_s16, 1 }
   0x5   : > { %p158_p2 = scmp.lt.s32.totalorder %s897_s16, 9 }
   0x6   : > { %s1085_s17 = smov (%p23_p0, %s22_s17), 0  ;;  %s1087_s18 = smov (!%p23_p0, %s25_s18), %s893_s15 }
   0x7   : > { %p159_p3 = pnand %p719_p1, %p158_p2  ;;  %p27_p4 = scmp.ge.s32.totalorder %s1087_s18, 2 }
   0x8   : > { %s720_s19 = sshll.u32 (!%p159_p3), %s881_s12, 2  ;;  %p191_p5 = scmp.lt.s32.totalorder (!%p159_p3), %s885_s13, 1 }
   0x9   : > { %s1089_s18 = smov (%p27_p4, %s1087_s18), 0  ;;  %162 = sbr.rel (%p159_p3) target bundleno = 1001 (0x3e9), region = 32 }
   0xa   : > { %p193_p6 = scmp.lt.s32.totalorder (!%p159_p3), %s720_s19, 15  ;;  %p726_p7 = scmp.ne.s32.totalorder (!%p159_p3), %s881_s12, 0 }
  0x10   : > { %s1091_s13 = smov (!%p191_p5, %s885_s13), 1  ;;  %s1093_s19 = smov (!%p193_p6, %s720_s19), 15 }
  0x11   : > { %s721_s20 = sshll.u32 %s1091_s13, 4  ;;  %213 = sbr.rel (%p726_p7) target bundleno = 24 (0x18), region = 36  ;;  %vm214_vm0 = vcmask (!%p726_p7), 261120   ;;  %v899_v0 = vmov (!%p726_p7), 0.0  }
  0x12   : > { %s196_s21 = sadd.s32 %s721_s20, %s1093_s19  ;;  %215 = vst.msk [vmem:[#allocation6] sm:$0xff] (!%p726_p7), %vm214_vm0, %v899_v0 }
  0x13   : > { %s722_s22 = sshll.u32 %s196_s21, 3 }
  0x14   : > { %s198_s25 = scalar_lea.vmem %s1076_s0, %s722_s22  ;;  %s959_s28 = scalar_lea.vmem %s1079_s3, %s722_s22 }
  0x18 PF: > { %v220_v1 = vld [vmem:[%s1077_s1] sm:$0xff]  ;;  %v221_v2 = vld [vmem:[%s1077_s1 + $0x8] sm:$0xff]  ;;  %vm222_vm1 = vcmask 130048   ;;  %v218_v6 = vld [vmem:[%s198_s25 + $0x10] sm:$0xff]  ;;  %vm348_vm2 = vcmask 261120   ;;  %s900_s6 = smov 96  }
  0x19   : > { %v216_v3 = vld [vmem:[%s198_s25] sm:$0xff]  ;;  %v779_v4 = vpack.c.bf16 %v221_v2, %v220_v1  ;;  %v217_v5 = vld [vmem:[%s198_s25 + $0x8] sm:$0xff]  ;;  %v219_v7 = vld [vmem:[%s198_s25 + $0x18] sm:$0xff]  ;;  %s901_s7 = smov 32   ;;  %s902_s8 = smov 64  }
  0x1a   : > { %759 = vmatprep.mubr.msk.f32.mxu0 %vm222_vm1, %v216_v3 }
  0x1b   : > { %780 = vmatprep.subr.bf16.mxu0 %v779_v4 }
  0x1c   : > { %782 = vmatpush3.bf16.msra.mxu0 %v779_v4 }
  0x1f   : > { %760 = vmatmul.mubr.msk.f32.vlgmr.msra.gmra.mrb[0].mxu0 %vm222_vm1, %v217_v5 }
  0x20   : > { %762 = vmatprep.mubr.msk.f32.mxu0 %vm222_vm1, %v218_v6 }
  0x23   : > { %763 = vmatmul.mubr.msk.f32.gmra.mrb[2].mxu0 %vm222_vm1, %v219_v7 }
  0xf2   : > { %v971_v8 = vpop.f32.mrb[0].mxu0 }
  0xf3   : > { %v732_v9 = vmul.f32 -1.442695, %v971_v8  ;;  %v974_v10 = vpop.f32.mrb[1].mxu0 }
  0xf4   : > { %v731_v11 = vmul.f32 -1.442695, %v974_v10 }
  0xf5   : > { %835 = vpow2.f32 %v732_v9 }
  0xf6   : > { %837 = vpow2.f32 %v731_v11  ;;  %v977_v12 = vpop.f32.mrb[2].mxu0 }
  0xf7   : > { %v734_v13 = vmul.f32 -1.442695, %v977_v12  ;;  %v980_v14 = vpop.f32.mrb[3].mxu0 }
  0xf8   : > { %v733_v15 = vmul.f32 -1.442695, %v980_v14 }
  0xf9   : > { %839 = vpow2.f32 %v734_v13 }
  0xfa   : > { %841 = vpow2.f32 %v733_v15  ;;  %v520_v15 = vld [vmem:[%s1078_s2] sm:$0xff] }
  0xff   : > { %v836_v16 = vpop.eup %835 }
 0x100   : > { %v838_v17 = vpop.eup %837  ;;  %v333_v18 = vadd.f32 1.0, %v836_v16  ;;  %v521_v16 = vld [vmem:[%s1078_s2 + $0x8] sm:$0xff] }
 0x101   : > { %v332_v19 = vadd.f32 1.0, %v838_v17 }
 0x102   : > { %843 = vrcp.f32 %v333_v18 }
 0x103   : > { %v840_v20 = vpop.eup %839  ;;  %845 = vrcp.f32 %v332_v19  ;;  %v783_v19 = vpack.c.bf16 %v521_v16, %v520_v15 }
 0x104   : > { %v842_v21 = vpop.eup %841  ;;  %v335_v22 = vadd.f32 1.0, %v840_v20  ;;  %v523_v20 = vld [vmem:[%s1078_s2 + $0x18] sm:$0xff] }
 0x105   : > { %v334_v23 = vadd.f32 1.0, %v842_v21  ;;  %784 = vmatprep.subr.bf16.mxu1 %v783_v19 }
 0x106   : > { %847 = vrcp.f32 %v335_v22  ;;  %786 = vmatpush3.bf16.msra.mxu1 %v783_v19 }
 0x107   : > { %849 = vrcp.f32 %v334_v23 }
 0x10c   : > { %v983_v24 = vpop.eup %843 }
 0x10d   : > { %v985_v25 = vpop.eup %845  ;;  %v345_v26 = vmul.f32 %v983_v24, %v971_v8 }
 0x10e   : > { %v344_v27 = vmul.f32 %v985_v25, %v974_v10  ;;  %357 = vrot.lane.b32.xlu0 %v985_v25, %s900_s6 }
 0x10f   : > { %350 = vst.msk [vmem:[#allocation5 + $0x8] sm:$0xff] %vm348_vm2, %v345_v26 }
 0x110   : > { %v994_v28 = vpop.eup %847  ;;  %349 = vst.msk [vmem:[#allocation5] sm:$0xff] %vm348_vm2, %v344_v27 }
 0x111   : > { %v850_v29 = vpop.eup %849  ;;  %v347_v30 = vmul.f32 %v994_v28, %v977_v12 }
 0x112   : > { %v346_v31 = vmul.f32 %v850_v29, %v980_v14  ;;  %359 = vrot.lane.b32.xlu0 %v983_v24, %s900_s6  ;;  %361 = vrot.lane.b32.xlu1 %v850_v29, %s900_s6 }
 0x113   : > { %352 = vst.msk [vmem:[#allocation5 + $0x18] sm:$0xff] %vm348_vm2, %v347_v30 }
 0x114   : > { %351 = vst.msk [vmem:[#allocation5 + $0x10] sm:$0xff] %vm348_vm2, %v346_v31 }
 0x116   : > { %363 = vrot.lane.b32.xlu1 %v994_v28, %s900_s6 }
 0x180   : > { %v358_v32 = vpop.permute.xlu0 %357 }
 0x181   : > { %v369_v33 = vadd.f32 %v985_v25, %v358_v32 }
 0x183   : > { %v373_v34 = vadd.f32 0.0001, %v369_v33 }
 0x184   : > { %v360_v35 = vpop.permute.xlu0 %359  ;;  %v362_v36 = vpop.permute.xlu1 %361 }
 0x185   : > { %851 = vrcp.f32 %v373_v34  ;;  %v370_v37 = vadd.f32 %v983_v24, %v360_v35  ;;  %v371_v38 = vadd.f32 %v850_v29, %v362_v36 }
 0x187   : > { %v374_v39 = vadd.f32 0.0001, %v370_v37  ;;  %v375_v40 = vadd.f32 0.0001, %v371_v38 }
 0x188   : > { %v364_v41 = vpop.permute.xlu1 %363 }
 0x189   : > { %853 = vrcp.f32 %v374_v39  ;;  %v372_v42 = vadd.f32 %v994_v28, %v364_v41 }
 0x18a   : > { %855 = vrcp.f32 %v375_v40 }
 0x18b   : > { %v376_v43 = vadd.f32 0.0001, %v372_v42 }
 0x18d   : > { %857 = vrcp.f32 %v376_v43 }
 0x18f   : > { %v852_v44 = vpop.eup %851 }
 0x190   : > { %v381_v45 = vmul.f32 %v852_v44, %v373_v34 }
 0x192   : > { %v385_v46 = vsub.f32 2.0, %v381_v45 }
 0x193   : > { %v854_v47 = vpop.eup %853 }
 0x194   : > { %v856_v48 = vpop.eup %855  ;;  %v382_v49 = vmul.f32 %v854_v47, %v374_v39  ;;  %v389_v50 = vmul.f32 %v852_v44, %v385_v46  ;;  %v508_v44 = vld [vmem:[#allocation5] sm:$0xff] }
 0x195   : > { %v383_v51 = vmul.f32 %v856_v48, %v375_v40 }
 0x196   : > { %v386_v52 = vsub.f32 2.0, %v382_v49  ;;  %421 = vrot.lane.b32.xlu0 %v389_v50, %s901_s7  ;;  %v393_v4 = vmul.f32 %v985_v25, %v389_v50  ;;  %v509_v50 = vld [vmem:[#allocation5 + $0x8] sm:$0xff] }
 0x197   : > { %v858_v53 = vpop.eup %857  ;;  %v387_v54 = vsub.f32 2.0, %v383_v51 }
 0x198   : > { %v384_v55 = vmul.f32 %v858_v53, %v376_v43  ;;  %v390_v56 = vmul.f32 %v854_v47, %v386_v52 }
 0x199   : > { %v391_v57 = vmul.f32 %v856_v48, %v387_v54 }
 0x19a   : > { %v388_v58 = vsub.f32 2.0, %v384_v55  ;;  %423 = vrot.lane.b32.xlu1 %v390_v56, %s901_s7  ;;  %v394_v5 = vmul.f32 %v983_v24, %v390_v56  ;;  %v511_v56 = vld [vmem:[#allocation5 + $0x18] sm:$0xff] }
 0x19b   : > { %425 = vrot.lane.b32.xlu0 %v391_v57, %s901_s7  ;;  %v395_v6 = vmul.f32 %v850_v29, %v391_v57 }
 0x19c   : > { %v392_v59 = vmul.f32 %v858_v53, %v388_v58  ;;  %v510_v53 = vld [vmem:[#allocation5 + $0x10] sm:$0xff] }
 0x19e   : > { %427 = vrot.lane.b32.xlu1 %v392_v59, %s901_s7  ;;  %v396_v7 = vmul.f32 %v994_v28, %v392_v59 }
 0x208   : > { %v422_v60 = vpop.permute.xlu0 %421 }
 0x209   : > { %v433_v61 = vmul.f32 %v985_v25, %v422_v60 }
 0x20b   : > { %441 = vrot.lane.b32.xlu0 %v433_v61, %s902_s8 }
 0x20c   : > { %v424_v62 = vpop.permute.xlu1 %423 }
 0x20d   : > { %v426_v63 = vpop.permute.xlu0 %425  ;;  %v434_v0 = vmul.f32 %v983_v24, %v424_v62 }
 0x20e   : > { %v435_v1 = vmul.f32 %v850_v29, %v426_v63 }
 0x20f   : > { %443 = vrot.lane.b32.xlu1 %v434_v0, %s902_s8 }
 0x210   : > { %445 = vrot.lane.b32.xlu0 %v435_v1, %s902_s8  ;;  %v428_v2 = vpop.permute.xlu1 %427 }
 0x211   : > { %v436_v3 = vmul.f32 %v994_v28, %v428_v2  ;;  %v477_v28 = vld [vmem:[#allocation6] sm:$0xff] }
 0x213   : > { %447 = vrot.lane.b32.xlu1 %v436_v3, %s902_s8 }
 0x214   : > { %401 = vrot.lane.b32.xlu0 %v393_v4, %s902_s8 }
 0x218   : > { %403 = vrot.lane.b32.xlu0 %v394_v5, %s902_s8 }
 0x21c   : > { %405 = vrot.lane.b32.xlu0 %v395_v6, %s902_s8 }
 0x220   : > { %407 = vrot.lane.b32.xlu0 %v396_v7, %s902_s8 }
 0x27d   : > { %v442_v9 = vpop.permute.xlu0 %441 }
 0x27e   : > { %v453_v11 = vmul.f32 %v442_v9, %v974_v10  ;;  %v522_v10 = vld [vmem:[%s1078_s2 + $0x10] sm:$0xff] }
 0x27f   : > { %v787_v23 = vpack.c.bf16 %v523_v20, %v522_v10 }
 0x280   : > { %461 = vrot.lane.b32.xlu1 %v453_v11, %s900_s6 }
 0x281   : > { %v444_v13 = vpop.permute.xlu1 %443  ;;  %788 = vmatprep.subr.bf16.mxu1 %v787_v23 }
 0x282   : > { %v446_v17 = vpop.permute.xlu0 %445  ;;  %v454_v18 = vmul.f32 %v971_v8, %v444_v13  ;;  %790 = vmatpush3.bf16.msra.mxu1 %v787_v23 }
 0x283   : > { %v455_v21 = vmul.f32 %v446_v17, %v980_v14 }
 0x284   : > { %463 = vrot.lane.b32.xlu1 %v454_v18, %s900_s6 }
 0x285   : > { %v448_v8 = vpop.permute.xlu1 %447 }
 0x286   : > { %v402_v22 = vpop.permute.xlu0 %401  ;;  %v456_v24 = vmul.f32 %v977_v12, %v448_v8 }
 0x287   : > { %413 = vst.msk [vmem:[#allocation2] sm:$0xff] %vm348_vm2, %v402_v22 }
 0x288   : > { %465 = vrot.lane.b32.xlu1 %v455_v21, %s900_s6 }
 0x28a   : > { %v404_v25 = vpop.permute.xlu0 %403 }
 0x28b   : > { %414 = vst.msk [vmem:[#allocation2 + $0x8] sm:$0xff] %vm348_vm2, %v404_v25 }
 0x28c   : > { %467 = vrot.lane.b32.xlu1 %v456_v24, %s900_s6 }
 0x28e   : > { %v406_v26 = vpop.permute.xlu0 %405  ;;  %v478_v29 = vld [vmem:[#allocation2] sm:$0xff] }
 0x28f   : > { %415 = vst.msk [vmem:[#allocation2 + $0x10] sm:$0xff] %vm348_vm2, %v406_v26  ;;  %v480_v12 = vmul.f32 %v478_v29, %v477_v28 }
 0x292   : > { %v408_v14 = vpop.permute.xlu0 %407  ;;  %v484_v34 = vld [vmem:[#allocation2 + $0x8] sm:$0xff] }
 0x293   : > { %416 = vst.msk [vmem:[#allocation2 + $0x18] sm:$0xff] %vm348_vm2, %v408_v14 }
 0x296   : > { %v492_v39 = vld [vmem:[#allocation2 + $0x10] sm:$0xff] }
 0x29a   : > { %v500_v43 = vld [vmem:[#allocation2 + $0x18] sm:$0xff] }
 0x2f2   : > { %v462_v27 = vpop.permute.xlu1 %461 }
 0x2f3   : > { %473 = vst.msk [vmem:[#allocation3] sm:$0xff] %vm348_vm2, %v462_v27 }
 0x2f6   : > { %v464_v30 = vpop.permute.xlu1 %463 }
 0x2f7   : > { %474 = vst.msk [vmem:[#allocation3 + $0x8] sm:$0xff] %vm348_vm2, %v464_v30 }
 0x2fa   : > { %v479_v31 = vld [vmem:[#allocation3] sm:$0xff]  ;;  %v466_v32 = vpop.permute.xlu1 %465 }
 0x2fb   : > { %v481_v33 = vadd.f32 %v480_v12, %v479_v31  ;;  %475 = vst.msk [vmem:[#allocation3 + $0x10] sm:$0xff] %vm348_vm2, %v466_v32 }
 0x2fd   : > { %482 = vst.msk [vmem:[#allocation4] sm:$0xff] %vm348_vm2, %v481_v33  ;;  %v487_v35 = vmul.f32 %v484_v34, %v481_v33 }
 0x2fe   : > { %v486_v36 = vld [vmem:[#allocation3 + $0x8] sm:$0xff]  ;;  %v468_v37 = vpop.permute.xlu1 %467 }
 0x2ff   : > { %v488_v38 = vadd.f32 %v487_v35, %v486_v36  ;;  %476 = vst.msk [vmem:[#allocation3 + $0x18] sm:$0xff] %vm348_vm2, %v468_v37 }
 0x301   : > { %490 = vst.msk [vmem:[#allocation4 + $0x8] sm:$0xff] %vm348_vm2, %v488_v38  ;;  %v495_v40 = vmul.f32 %v492_v39, %v488_v38 }
 0x302   : > { %v494_v41 = vld [vmem:[#allocation3 + $0x10] sm:$0xff] }
 0x303   : > { %v496_v42 = vadd.f32 %v495_v40, %v494_v41 }
 0x304   : > { %v512_v45 = vld [vmem:[#allocation4] sm:$0xff] }
 0x305   : > { %498 = vst.msk [vmem:[#allocation4 + $0x10] sm:$0xff] %vm348_vm2, %v496_v42  ;;  %v503_v46 = vmul.f32 %v500_v43, %v496_v42  ;;  %v516_v47 = vmul.f32 %v512_v45, %v508_v44 }
 0x306   : > { %v502_v48 = vld [vmem:[#allocation3 + $0x18] sm:$0xff] }
 0x307   : > { %v504_v49 = vadd.f32 %v503_v46, %v502_v48  ;;  %773 = vmatprep.mubr.msk.f32.mxu1 %vm348_vm2, %v516_v47 }
 0x308   : > { %v513_v51 = vld [vmem:[#allocation4 + $0x8] sm:$0xff] }
 0x309   : > { %506 = vst.msk [vmem:[#allocation4 + $0x18] sm:$0xff] %vm348_vm2, %v504_v49  ;;  %507 = vst.msk [vmem:[#allocation6] sm:$0xff] %vm348_vm2, %v504_v49  ;;  %v517_v52 = vmul.f32 %v513_v51, %v509_v50 }
 0x30b   : > { %774 = vmatmul.mubr.msk.f32.vlgmr.msra.gmra.mrb[0].mxu1 %vm348_vm2, %v517_v52 }
 0x30c   : > { %v514_v54 = vld [vmem:[#allocation4 + $0x10] sm:$0xff] }
 0x30d   : > { %v518_v55 = vmul.f32 %v514_v54, %v510_v53 }
 0x30f   : > { %776 = vmatprep.mubr.msk.f32.mxu1 %vm348_vm2, %v518_v55 }
 0x310   : > { %v515_v57 = vld [vmem:[#allocation4 + $0x18] sm:$0xff] }
 0x311   : > { %v519_v58 = vmul.f32 %v515_v57, %v511_v56 }
 0x313   : > { %777 = vmatmul.mubr.msk.f32.gmra.mrb[2].mxu1 %vm348_vm2, %v519_v58 }
 0x3de   : > { %v775_v59 = vpop.f32.mrb[0].mxu1 }
 0x3df   : > { %622 = vst.msk [vmem:[%s959_s28 + $0x8] sm:$0xff] %vm222_vm1, %v775_v59  ;;  %v602_v60 = vpop.f32.mrb[1].mxu1 }
 0x3e0   : > { %621 = vst.msk [vmem:[%s959_s28] sm:$0xff] %vm222_vm1, %v602_v60 }
 0x3e6   : > { %v778_v61 = vpop.f32.mrb[2].mxu1 }
 0x3e7   : > { %624 = vst.msk [vmem:[%s959_s28 + $0x18] sm:$0xff] %vm222_vm1, %v778_v61  ;;  %v612_v62 = vpop.f32.mrb[3].mxu1 }
 0x3e8   : > { %623 = vst.msk [vmem:[%s959_s28 + $0x10] sm:$0xff] %vm222_vm1, %v612_v62 }
 0x3e9 PF: > { %s13_s16 = sadd.s32 1, %s897_s16   ;;  %s1080_s12 = smov %s889_s14 }
 0x3ea   : > { %p10_p8 = scmp.ge.s32.totalorder %s13_s16, 10   ;;  %s1081_s13 = smov %s893_s15 }
 0x3eb   : > { %s1082_s14 = smov %s1085_s17  ;;  %s1083_s15 = smov %s1089_s18 }
 0x3ec   :  { %12 = sbr.rel (!%p10_p8) target bundleno = 3 (0x3), region = 75 }

</bundles_post_ra>
